<compile_context>
chip_gen: v5e
topology: v5e:2x2
jax: 0.10.0
libtpu: 0.0.40
codegen_flags: <defaults>
</compile_context>

<pallas_src>
import math

import jax
import jax.numpy as jnp
from jax.experimental import pallas as pl
from jax.experimental.pallas import tpu as pltpu


def _round_up(x, m):
    return ((x + m - 1) // m) * m


def _pick_tile(dim, prefs):
    """Largest preferred tile that evenly divides `dim` (dim is 128-aligned)."""
    for t in prefs:
        if dim % t == 0:
            return t
    return dim


def _maybe_pad(a, pads):
    """jnp.pad, skipped entirely when no padding is needed (saves an HBM pass)."""
    if all(lo == 0 and hi == 0 for lo, hi in pads):
        return a
    return jnp.pad(a, pads)


def _vmem_capacity_bytes():
    try:
        return int(pltpu.get_tpu_info().vmem_capacity_bytes)
    except Exception:
        return 128 * 1024 * 1024  # v5e/v6e default if the query is unavailable


def _tiling_config():
    """Generation-dependent tile preferences and scoped-VMEM budget."""
    vmem = _vmem_capacity_bytes()
    if vmem >= 96 * 1024 * 1024:
        # v5e / v6e: 128 MiB physical VMEM -> big tiles amortize per-step
        # overhead and keep the 2x256x256 MXU (v6e) filled.
        return dict(row_prefs=(1024, 512, 256, 128),
                    col_prefs=(512, 256, 128),
                    k_prefs=(1024, 512, 256, 128),
                    vmem_limit=64 * 1024 * 1024)
    # v7x: 64 MiB physical VMEM per TensorCore -> stay well under half so the
    # pipeline keeps its 2-deep double-buffering.
    return dict(row_prefs=(512, 256, 128),
                col_prefs=(512, 256, 128),
                k_prefs=(512, 256, 128),
                vmem_limit=48 * 1024 * 1024)


# ---------------------------------------------------------------------------
# Generic tiled matmul kernels (optional fused bias, optional K accumulation).
# ---------------------------------------------------------------------------
def _mm_kernel_1k(a_ref, b_ref, o_ref):
    o_ref[...] = jnp.dot(a_ref[...], b_ref[...],
                         preferred_element_type=jnp.float32).astype(o_ref.dtype)


def _mm_kernel_1k_bias(a_ref, b_ref, bias_ref, o_ref):
    acc = jnp.dot(a_ref[...], b_ref[...], preferred_element_type=jnp.float32)
    o_ref[...] = (acc + bias_ref[...]).astype(o_ref.dtype)


def _mm_kernel(a_ref, b_ref, o_ref, acc_ref):
    @pl.when(pl.program_id(2) == 0)
    def _init():
        acc_ref[...] = jnp.zeros_like(acc_ref)

    acc_ref[...] += jnp.dot(a_ref[...], b_ref[...],
                            preferred_element_type=jnp.float32)

    @pl.when(pl.program_id(2) == pl.num_programs(2) - 1)
    def _store():
        o_ref[...] = acc_ref[...].astype(o_ref.dtype)


def _mm_kernel_bias(a_ref, b_ref, bias_ref, o_ref, acc_ref):
    @pl.when(pl.program_id(2) == 0)
    def _init():
        acc_ref[...] = jnp.zeros_like(acc_ref)

    acc_ref[...] += jnp.dot(a_ref[...], b_ref[...],
                            preferred_element_type=jnp.float32)

    @pl.when(pl.program_id(2) == pl.num_programs(2) - 1)
    def _store():
        # Bias (f32) is added exactly once, in the finalize branch.
        o_ref[...] = (acc_ref[...] + bias_ref[...]).astype(o_ref.dtype)


def _matmul(a, b, bias, out_dtype, cfg):
    """out = a @ b (+ bias), tiled.  a:(M,K), b:(K,N), bias:(1,N) f32 or None.

    All of M, N, K must be multiples of 128 (caller pads).  Accumulation is
    f32; the result is cast to out_dtype inside the kernel.
    """
    M, K = a.shape
    K2, N = b.shape
    assert K == K2
    tm = _pick_tile(M, cfg["row_prefs"])
    tn = _pick_tile(N, cfg["col_prefs"])
    tk = _pick_tile(K, cfg["k_prefs"])     # reduction tile independent of tm/tn
    gm, gn, gk = M // tm, N // tn, K // tk

    # Advisory HBM-traffic estimate, including per-tile re-read factors.
    bytes_accessed = (M * K * a.dtype.itemsize * gn
                      + K * N * b.dtype.itemsize * gm
                      + M * N * jnp.dtype(out_dtype).itemsize)
    if bias is not None:
        bytes_accessed += bias.size * bias.dtype.itemsize * gm
    cost = pl.CostEstimate(flops=2 * M * N * K, transcendentals=0,
                           bytes_accessed=bytes_accessed)

    if gk == 1:
        # Single reduction step (common case): skip the scratch accumulator,
        # the zero-init and the acc->out copy entirely.
        kernel = _mm_kernel_1k_bias if bias is not None else _mm_kernel_1k
        in_specs = [pl.BlockSpec((tm, tk), lambda i, j: (i, 0)),
                    pl.BlockSpec((tk, tn), lambda i, j: (0, j))]
        if bias is not None:
            in_specs.append(pl.BlockSpec((1, tn), lambda i, j: (0, j)))
        grid_spec = pltpu.PrefetchScalarGridSpec(
            num_scalar_prefetch=0,
            grid=(gm, gn),
            in_specs=in_specs,
            out_specs=pl.BlockSpec((tm, tn), lambda i, j: (i, j)))
        dims = ("parallel", "parallel")
    else:
        kernel = _mm_kernel_bias if bias is not None else _mm_kernel
        in_specs = [pl.BlockSpec((tm, tk), lambda i, j, k: (i, k)),
                    pl.BlockSpec((tk, tn), lambda i, j, k: (k, j))]
        if bias is not None:
            in_specs.append(pl.BlockSpec((1, tn), lambda i, j, k: (0, j)))
        grid_spec = pltpu.PrefetchScalarGridSpec(
            num_scalar_prefetch=0,
            grid=(gm, gn, gk),
            in_specs=in_specs,
            out_specs=pl.BlockSpec((tm, tn), lambda i, j, k: (i, j)),
            scratch_shapes=[pltpu.VMEM((tm, tn), jnp.float32)])
        dims = ("parallel", "parallel", "arbitrary")

    args = (a, b) if bias is None else (a, b, bias)
    return pl.pallas_call(
        kernel,
        out_shape=jax.ShapeDtypeStruct((M, N), out_dtype),
        grid_spec=grid_spec,
        compiler_params=pltpu.CompilerParams(
            dimension_semantics=dims,
            vmem_limit_bytes=cfg["vmem_limit"]),
        cost_estimate=cost,
    )(*args)


# ---------------------------------------------------------------------------
# Wrapper: GCN forward.
# ---------------------------------------------------------------------------
def graph_convolution(x, weight, adj, bias, *, compute_dtype=jnp.bfloat16):
    """x: (B, N, Cin), weight: (Cin, Cout), adj: (N, N), bias: (Cout,) or None.

    MXU operands are fed in `compute_dtype` (bf16 by default); accumulation is
    always f32 and the result is returned in x.dtype.
    """
    B, N, Cin = x.shape
    Cout = weight.shape[1]
    assert weight.shape[0] == Cin
    assert adj.shape == (N, N)
    out_dtype = x.dtype
    cfg = _tiling_config()

    cin_p = _round_up(Cin, 128)
    cout_p = _round_up(Cout, 128)
    n_p = _round_up(N, 128)

    # Node-major layout: rows ordered (node, batch) so the inter-stage reshapes
    # (n_p*B, C) <-> (n_p, B*C) are free bitcasts and adj is streamed once.
    x_nm = jnp.transpose(x, (1, 0, 2)).astype(compute_dtype)          # (N,B,Cin)
    x_nm = _maybe_pad(x_nm, ((0, n_p - N), (0, 0), (0, cin_p - Cin)))
    adj_p = _maybe_pad(adj.astype(compute_dtype),
                       ((0, n_p - N), (0, n_p - N)))
    w_p = _maybe_pad(weight.astype(compute_dtype),
                     ((0, cin_p - Cin), (0, cout_p - Cout)))
    if bias is not None:
        bias_p = _maybe_pad(bias.astype(jnp.float32).reshape(1, Cout),
                            ((0, 0), (0, cout_p - Cout)))              # (1,cout_p)
    else:
        bias_p = None

    if Cin < Cout:
        # (adj @ X) @ W : the HBM-round-tripped intermediate has Cin lanes.
        ax = _matmul(adj_p, x_nm.reshape(n_p, B * cin_p),
                     None, compute_dtype, cfg)                          # (n_p, B*cin_p)
        out2 = _matmul(ax.reshape(n_p * B, cin_p), w_p,
                       bias_p, out_dtype, cfg)                          # (n_p*B, cout_p)
    else:
        # adj @ (X @ W) : the intermediate has Cout lanes.
        support = _matmul(x_nm.reshape(n_p * B, cin_p), w_p,
                          None, compute_dtype, cfg)                     # (n_p*B, cout_p)
        bias_wide = None if bias_p is None else jnp.tile(bias_p, (1, B))
        out2 = _matmul(adj_p, support.reshape(n_p, B * cout_p),
                       bias_wide, out_dtype, cfg)                       # (n_p, B*cout_p)

    out = jnp.transpose(out2.reshape(n_p, B, cout_p), (1, 0, 2))        # (B,n_p,cout_p)
    if n_p != N or cout_p != Cout:
        out = out[:, :N, :Cout]
    return out


def init_params(key, in_features, out_features, num_nodes):
    """Deterministic parameter init mirroring the PyTorch module's reset_parameters.

    kaiming_uniform_(a=sqrt(5)) on a (Cin, Cout) matrix == U(-bound, bound)
    with bound = sqrt(1 / fan_in), fan_in = Cin.
    Bias: U(-1/sqrt(fan_in), 1/sqrt(fan_in)).
    """
    kw, kb, ka = jax.random.split(key, 3)
    fan_in = in_features
    w_bound = math.sqrt(1.0 / fan_in)
    weight = jax.random.uniform(
        kw, (in_features, out_features), jnp.float32, -w_bound, w_bound)
    b_bound = 1.0 / math.sqrt(fan_in)
    bias = jax.random.uniform(kb, (out_features,), jnp.float32, -b_bound, b_bound)

    # TODO(synk): real model loads adj from mat_path (.npy); a deterministic
    # synthetic symmetric row-normalized adjacency is built in-script instead.
    a = jax.random.uniform(ka, (num_nodes, num_nodes), jnp.float32)
    a = (a + a.T) * 0.5 + jnp.eye(num_nodes, dtype=jnp.float32)
    adj = a / jnp.sum(a, axis=1, keepdims=True)
    return weight, bias, adj


def _reference(x, weight, adj, bias):
    support = jnp.einsum("bnc,co->bno", x, weight)
    out = jnp.einsum("nm,bmo->bno", adj, support)
    if bias is not None:
        out = out + bias
    return out


if __name__ == "__main__":
    key = jax.random.PRNGKey(0)

    # Case 1: Cin >= Cout path (adj @ (X @ W)).
    B, N, Cin, Cout = 2, 16, 32, 32
    kx, kp, kx2, kp2 = jax.random.split(key, 4)
    x = jax.random.normal(kx, (B, N, Cin), dtype=jnp.float32)
    weight, bias, adj = init_params(kp, Cin, Cout, N)
    out = jax.block_until_ready(graph_convolution(x, weight, adj, bias))
    ref = _reference(x, weight, adj, bias)
    assert out.shape == (B, N, Cout)
    assert jnp.allclose(out, ref, atol=5e-2, rtol=5e-2)

    # Case 2: Cin < Cout path ((adj @ X) @ W).
    B2, N2, Cin2, Cout2 = 2, 16, 16, 48
    x2 = jax.random.normal(kx2, (B2, N2, Cin2), dtype=jnp.float32)
    weight2, bias2, adj2 = init_params(kp2, Cin2, Cout2, N2)
    out2 = jax.block_until_ready(graph_convolution(x2, weight2, adj2, bias2))
    ref2 = _reference(x2, weight2, adj2, bias2)
    assert out2.shape == (B2, N2, Cout2)
    assert jnp.allclose(out2, ref2, atol=5e-2, rtol=5e-2)

    print("KERNEL_OK")
</pallas_src>

<mosaic_0001>
module attributes {stable_mosaic.version = 11 : i64} {
  func.func @_mm_kernel_1k(%arg0: i32, %arg1: i32, %arg2: memref<256x128xbf16, #tpu.memory_space<vmem>>, %arg3: memref<128x128xbf16, #tpu.memory_space<vmem>>, %arg4: memref<256x128xbf16, #tpu.memory_space<vmem>>) attributes {dimension_semantics = [#tpu.dimension_semantics<parallel>, #tpu.dimension_semantics<parallel>], iteration_bounds = array<i64: 1, 1>, scalar_prefetch = 0 : i64, scratch_operands = 0 : i64, tpu.core_type = #tpu.core_type<tc>, window_params = [{transform_indices = @transform_0, window_bounds = array<i64: 256, 128>}, {transform_indices = @transform_1, window_bounds = array<i64: 128, 128>}, {transform_indices = @transform_2, window_bounds = array<i64: 256, 128>}]} {
    %c0 = arith.constant 0 : index
    %c0_0 = arith.constant 0 : index
    %0 = vector.load %arg2[%c0, %c0_0] : memref<256x128xbf16, #tpu.memory_space<vmem>>, vector<256x128xbf16>
    %c0_1 = arith.constant 0 : index
    %c0_2 = arith.constant 0 : index
    %1 = vector.load %arg3[%c0_1, %c0_2] : memref<128x128xbf16, #tpu.memory_space<vmem>>, vector<128x128xbf16>
    %cst = arith.constant dense<0.000000e+00> : vector<256x128xf32>
    %2 = tpu.matmul %0, %1, %cst {dimension_numbers = #tpu.dot_dimension_numbers<[1], [0], [0], [1], [0, 0, 1, 1], [], []>} : vector<256x128xbf16>, vector<128x128xbf16>, vector<256x128xf32> -> vector<256x128xf32>
    %3 = arith.truncf %2 : vector<256x128xf32> to vector<256x128xbf16>
    %c0_3 = arith.constant 0 : index
    %c0_4 = arith.constant 0 : index
    %4 = vector.load %arg4[%c0_3, %c0_4] : memref<256x128xbf16, #tpu.memory_space<vmem>>, vector<256x128xbf16>
    tpu.vector_store %arg4[%c0_3, %c0_4], %3 {strides = array<i32>} : memref<256x128xbf16, #tpu.memory_space<vmem>>, vector<256x128xbf16>,
    return
  }
  func.func @transform_0(%arg0: i32, %arg1: i32) -> (i32, i32) {
    %c0_i32 = arith.constant 0 : i32
    %c0_i32_0 = arith.constant 0 : i32
    return %arg0, %c0_i32 : i32, i32
  }
  func.func @transform_1(%arg0: i32, %arg1: i32) -> (i32, i32) {
    %c0_i32 = arith.constant 0 : i32
    %c0_i32_0 = arith.constant 0 : i32
    return %c0_i32, %arg1 : i32, i32
  }
  func.func @transform_2(%arg0: i32, %arg1: i32) -> (i32, i32) {
    %c0_i32 = arith.constant 0 : i32
    return %arg0, %arg1 : i32, i32
  }
}

</mosaic_0001>

<bundles_post_ra>
// kernel: tpu_custom_call.1
= control target key start
LH: loop header
LB: loop body
LE: loop exit
PB: predicated region body
PF: predicated region fallthrough
CT: control target
= control target key end

     0   :  { %7 = vsyncpa [#allocation3], 0  ;;  %s769_s0 = inlined_call_operand.hbm [shape: bf16[256,128], index: 0, kind: input, shape index: {}]   ;;  %s770_s1 = inlined_call_operand.hbm [shape: bf16[128,128], index: 1, kind: input, shape index: {}]   ;;  %s771_s2 = inlined_call_operand.hbm [shape: bf16[256,128], index: 2, kind: output, shape index: {}]  }
   0x1   :  { %8 = vsyncpa [#allocation6], 0 }
   0x2   :  { %9 = vsyncpa [#allocation4], 0  ;;  %s14_s11 = sshll.u32 %s769_s0, 4  ;;  %s731_s12 = smov [#allocation2]   ;;  %s15_s11 = int_to_ptr.hbm [resolvable:$true] %s14_s11 }
   0x3   :  { %s16_s13 = sshll.u32 %s731_s12, 4  ;;  %s27_s16 = sshll.u32 %s770_s1, 4  ;;  %s17_s13 = int_to_ptr.vmem [resolvable:$true] %s16_s13  ;;  %s28_s16 = int_to_ptr.hbm [resolvable:$true] %s27_s16 }
   0x4   :  { %s732_s17 = smov 64   ;;  %s733_s18 = smov 4  }
   0x5   :  { %22 = dma.hbm_to_vmem [thread:$0]  %s15_s11, 2048, %s17_s13, [#allocation3], %s732_s17, %s732_s17, %s733_s18  }
   0x6   :  { %s734_s19 = smov [#allocation5]  }
   0x7   :  { %s29_s20 = sshll.u32 %s734_s19, 4  ;;  %s30_s20 = int_to_ptr.vmem [resolvable:$true] %s29_s20 }
   0x8   :  { %35 = dma.hbm_to_vmem [thread:$0]  %s28_s16, 1024, %s30_s20, [#allocation6], %s732_s17, %s732_s17, %s733_s18  }
   0x9   :  { %725 = dma.done.wait [#allocation3], 2048  }
   0xa   :  { %726 = vsyncadd [#allocation3], 4294965248 }
   0xb   :  { %727 = dma.done.wait [#allocation6], 1024  }
   0xc   :  { %728 = vsyncadd [#allocation6], 4294966272  ;;  %v528_v0 = vld [vmem:[#allocation5 + $0x38] sm:$0xff]  ;;  %v527_v1 = vld [vmem:[#allocation5 + $0x30] sm:$0xff]  ;;  %s735_s0 = smov [#allocation7]   ;;  %s395_s23 = sshll.u32 %s771_s2, 4  ;;  %s396_s23 = int_to_ptr.hbm [resolvable:$true] %s395_s23 }
   0xd   :  { %236 = vmatpush.bf16.msra.mxu0 %v528_v0  ;;  %624 = vmatpush.bf16.msra.mxu1 %v528_v0  ;;  %v526_v2 = vld [vmem:[#allocation5 + $0x28] sm:$0xff]  ;;  %v525_v3 = vld [vmem:[#allocation5 + $0x20] sm:$0xff]  ;;  %v524_v4 = vld [vmem:[#allocation5 + $0x18] sm:$0xff]  ;;  %s393_s1 = sshll.u32 %s735_s0, 4  ;;  %s394_s1 = int_to_ptr.vmem [resolvable:$true] %s393_s1 }
   0xe   :  { %625 = vmatpush.bf16.msra.mxu2 %v528_v0  ;;  %626 = vmatpush.bf16.msra.mxu3 %v528_v0  ;;  %v523_v5 = vld [vmem:[#allocation5 + $0x10] sm:$0xff]  ;;  %v522_v6 = vld [vmem:[#allocation5 + $0x8] sm:$0xff]  ;;  %v521_v7 = vld [vmem:[#allocation5] sm:$0xff] }
   0xf   :  { %v505_v8 = vld [vmem:[#allocation2] sm:$0xff]  ;;  %v506_v12 = vld [vmem:[#allocation2 + $0x8] sm:$0xff]  ;;  %v507_v16 = vld [vmem:[#allocation2 + $0x10] sm:$0xff] }
  0x10   :  { %v509_v9 = vld [vmem:[#allocation2 + $0x20] sm:$0xff]  ;;  %v510_v13 = vld [vmem:[#allocation2 + $0x28] sm:$0xff]  ;;  %v511_v17 = vld [vmem:[#allocation2 + $0x30] sm:$0xff] }
  0x11   :  { %237 = vmatpush.bf16.msra.mxu0 %v527_v1  ;;  %627 = vmatpush.bf16.msra.mxu1 %v527_v1  ;;  %v513_v10 = vld [vmem:[#allocation2 + $0x40] sm:$0xff]  ;;  %v514_v14 = vld [vmem:[#allocation2 + $0x48] sm:$0xff]  ;;  %v515_v18 = vld [vmem:[#allocation2 + $0x50] sm:$0xff] }
  0x12   :  { %628 = vmatpush.bf16.msra.mxu2 %v527_v1  ;;  %629 = vmatpush.bf16.msra.mxu3 %v527_v1  ;;  %v517_v11 = vld [vmem:[#allocation2 + $0x60] sm:$0xff]  ;;  %v518_v15 = vld [vmem:[#allocation2 + $0x68] sm:$0xff]  ;;  %v519_v19 = vld [vmem:[#allocation2 + $0x70] sm:$0xff] }
  0x13   :  { %v508_v20 = vld [vmem:[#allocation2 + $0x18] sm:$0xff] }
  0x14   :  { %v512_v21 = vld [vmem:[#allocation2 + $0x38] sm:$0xff] }
  0x15   :  { %238 = vmatpush.bf16.msra.mxu0 %v526_v2  ;;  %630 = vmatpush.bf16.msra.mxu1 %v526_v2  ;;  %v516_v22 = vld [vmem:[#allocation2 + $0x58] sm:$0xff] }
  0x16   :  { %631 = vmatpush.bf16.msra.mxu2 %v526_v2  ;;  %632 = vmatpush.bf16.msra.mxu3 %v526_v2  ;;  %v520_v23 = vld [vmem:[#allocation2 + $0x78] sm:$0xff] }
  0x19   :  { %239 = vmatpush.bf16.msra.mxu0 %v525_v3  ;;  %633 = vmatpush.bf16.msra.mxu1 %v525_v3 }
  0x1a   :  { %634 = vmatpush.bf16.msra.mxu2 %v525_v3  ;;  %635 = vmatpush.bf16.msra.mxu3 %v525_v3 }
  0x1d   :  { %240 = vmatpush.bf16.msra.mxu0 %v524_v4  ;;  %636 = vmatpush.bf16.msra.mxu1 %v524_v4 }
  0x1e   :  { %637 = vmatpush.bf16.msra.mxu2 %v524_v4  ;;  %638 = vmatpush.bf16.msra.mxu3 %v524_v4 }
  0x21   :  { %241 = vmatpush.bf16.msra.mxu0 %v523_v5  ;;  %639 = vmatpush.bf16.msra.mxu1 %v523_v5 }
  0x22   :  { %640 = vmatpush.bf16.msra.mxu2 %v523_v5  ;;  %641 = vmatpush.bf16.msra.mxu3 %v523_v5 }
  0x25   :  { %242 = vmatpush.bf16.msra.mxu0 %v522_v6  ;;  %642 = vmatpush.bf16.msra.mxu1 %v522_v6 }
  0x26   :  { %643 = vmatpush.bf16.msra.mxu2 %v522_v6  ;;  %644 = vmatpush.bf16.msra.mxu3 %v522_v6 }
  0x29   :  { %243 = vmatpush.bf16.msra.mxu0 %v521_v7  ;;  %645 = vmatpush.bf16.msra.mxu1 %v521_v7 }
  0x2a   :  { %646 = vmatpush.bf16.msra.mxu2 %v521_v7  ;;  %647 = vmatpush.bf16.msra.mxu3 %v521_v7 }
  0x2c   :  { %244 = vmatmul.bf16.vlgmr.msra.gmra.mxu0 %v505_v8  ;;  %264 = vmatmul.bf16.vlgmr.msra.gmra.mxu1 %v509_v9 }
  0x2d   :  { %284 = vmatmul.bf16.vlgmr.msra.gmra.mxu2 %v513_v10  ;;  %304 = vmatmul.bf16.vlgmr.msra.gmra.mxu3 %v517_v11 }
  0x3c   :  { %249 = vmatmul.bf16.gmra.mxu0 %v506_v12  ;;  %269 = vmatmul.bf16.gmra.mxu1 %v510_v13 }
  0x3d   :  { %289 = vmatmul.bf16.gmra.mxu2 %v514_v14  ;;  %309 = vmatmul.bf16.gmra.mxu3 %v518_v15 }
  0x4c   :  { %254 = vmatmul.bf16.gmra.mxu0 %v507_v16  ;;  %274 = vmatmul.bf16.gmra.mxu1 %v511_v17 }
  0x4d   :  { %294 = vmatmul.bf16.gmra.mxu2 %v515_v18  ;;  %314 = vmatmul.bf16.gmra.mxu3 %v519_v19 }
  0x5c   :  { %259 = vmatmul.bf16.gmra.mxu0 %v508_v20  ;;  %279 = vmatmul.bf16.gmra.mxu1 %v512_v21 }
  0x5d   :  { %299 = vmatmul.bf16.gmra.mxu2 %v516_v22  ;;  %319 = vmatmul.bf16.gmra.mxu3 %v520_v23 }
  0xa9   :  { %v245_v24 = vpop.f32.mrf.mxu0  ;;  %v265_v25 = vpop.f32.mrf.mxu1 }
  0xb0   :  { %v285_v26 = vpop.f32.mrf.mxu2  ;;  %v305_v27 = vpop.f32.mrf.mxu3 }
  0xb1   :  { %v247_v28 = vpop.f32.mrf.mxu0  ;;  %v267_v29 = vpop.f32.mrf.mxu1 }
  0xb2   :  { %v532_v30 = vpack.c.bf16 %v247_v28, %v245_v24  ;;  %v552_v31 = vpack.c.bf16 %v267_v29, %v265_v25 }
  0xb4   :  { %533 = vst [vmem:[#allocation7] sm:$0xff] %v532_v30  }
  0xb5   :  { %612 = vst [vmem:[#allocation7 + $0x20] sm:$0xff] %v552_v31  }
  0xb8   :  { %v287_v32 = vpop.f32.mrf.mxu2  ;;  %v307_v33 = vpop.f32.mrf.mxu3 }
  0xb9   :  { %v572_v34 = vpack.c.bf16 %v287_v32, %v285_v26  ;;  %v592_v35 = vpack.c.bf16 %v307_v33, %v305_v27  ;;  %v250_v36 = vpop.f32.mrf.mxu0  ;;  %v270_v37 = vpop.f32.mrf.mxu1 }
  0xbb   :  { %616 = vst [vmem:[#allocation7 + $0x40] sm:$0xff] %v572_v34  }
  0xbc   :  { %620 = vst [vmem:[#allocation7 + $0x60] sm:$0xff] %v592_v35  }
  0xc0   :  { %v290_v38 = vpop.f32.mrf.mxu2  ;;  %v310_v39 = vpop.f32.mrf.mxu3 }
  0xc1   :  { %v252_v40 = vpop.f32.mrf.mxu0  ;;  %v272_v41 = vpop.f32.mrf.mxu1 }
  0xc2   :  { %v537_v42 = vpack.c.bf16 %v252_v40, %v250_v36  ;;  %v557_v43 = vpack.c.bf16 %v272_v41, %v270_v37 }
  0xc4   :  { %609 = vst [vmem:[#allocation7 + $0x8] sm:$0xff] %v537_v42  }
  0xc5   :  { %613 = vst [vmem:[#allocation7 + $0x28] sm:$0xff] %v557_v43  }
  0xc8   :  { %v292_v44 = vpop.f32.mrf.mxu2  ;;  %v312_v45 = vpop.f32.mrf.mxu3 }
  0xc9   :  { %v577_v46 = vpack.c.bf16 %v292_v44, %v290_v38  ;;  %v597_v47 = vpack.c.bf16 %v312_v45, %v310_v39  ;;  %v255_v48 = vpop.f32.mrf.mxu0  ;;  %v275_v49 = vpop.f32.mrf.mxu1 }
  0xcb   :  { %617 = vst [vmem:[#allocation7 + $0x48] sm:$0xff] %v577_v46  }
  0xcc   :  { %621 = vst [vmem:[#allocation7 + $0x68] sm:$0xff] %v597_v47  }
  0xd0   :  { %v295_v50 = vpop.f32.mrf.mxu2  ;;  %v315_v51 = vpop.f32.mrf.mxu3 }
  0xd1   :  { %v257_v52 = vpop.f32.mrf.mxu0  ;;  %v277_v53 = vpop.f32.mrf.mxu1 }
  0xd2   :  { %v542_v54 = vpack.c.bf16 %v257_v52, %v255_v48  ;;  %v562_v55 = vpack.c.bf16 %v277_v53, %v275_v49 }
  0xd4   :  { %610 = vst [vmem:[#allocation7 + $0x10] sm:$0xff] %v542_v54  }
  0xd5   :  { %614 = vst [vmem:[#allocation7 + $0x30] sm:$0xff] %v562_v55  }
  0xd8   :  { %v297_v56 = vpop.f32.mrf.mxu2  ;;  %v317_v57 = vpop.f32.mrf.mxu3 }
  0xd9   :  { %v582_v58 = vpack.c.bf16 %v297_v56, %v295_v50  ;;  %v602_v59 = vpack.c.bf16 %v317_v57, %v315_v51  ;;  %v260_v60 = vpop.f32.mrf.mxu0  ;;  %v280_v61 = vpop.f32.mrf.mxu1 }
  0xdb   :  { %618 = vst [vmem:[#allocation7 + $0x50] sm:$0xff] %v582_v58  }
  0xdc   :  { %622 = vst [vmem:[#allocation7 + $0x70] sm:$0xff] %v602_v59  }
  0xe0   :  { %v300_v62 = vpop.f32.mrf.mxu2  ;;  %v320_v63 = vpop.f32.mrf.mxu3 }
  0xe1   :  { %v262_v0 = vpop.f32.mrf.mxu0  ;;  %v282_v1 = vpop.f32.mrf.mxu1 }
  0xe2   :  { %v547_v2 = vpack.c.bf16 %v262_v0, %v260_v60  ;;  %v567_v3 = vpack.c.bf16 %v282_v1, %v280_v61 }
  0xe4   :  { %611 = vst [vmem:[#allocation7 + $0x18] sm:$0xff] %v547_v2  }
  0xe5   :  { %615 = vst [vmem:[#allocation7 + $0x38] sm:$0xff] %v567_v3  }
  0xe8   :  { %v302_v4 = vpop.f32.mrf.mxu2  ;;  %v322_v5 = vpop.f32.mrf.mxu3 }
  0xe9   :  { %v587_v6 = vpack.c.bf16 %v302_v4, %v300_v62  ;;  %v607_v7 = vpack.c.bf16 %v322_v5, %v320_v63 }
  0xeb   :  { %619 = vst [vmem:[#allocation7 + $0x58] sm:$0xff] %v587_v6  }
  0xec   :  { %623 = vst [vmem:[#allocation7 + $0x78] sm:$0xff] %v607_v7  }
  0xed   :  { %401 = dma.vmem_to_hbm [thread:$0]  %s394_s1, 2048, %s396_s23, [#allocation4], %s732_s17, %s732_s17, %s733_s18  }
  0xee   :  { %729 = dma.done.wait [#allocation4], 2048  }
  0xef   :  { %730 = vsyncadd [#allocation4], 4294965248 }
  0xf0   :  { %406 = vsyncpa [#allocation3], 1 }
  0xf1   :  { %407 = vsyncpa [#allocation6], 1 }
  0xf2   :  { %408 = vsyncpa [#allocation4], 1 }

</bundles_post_ra>
